<compile_context>
chip_gen: v7x
topology: tpu7x:2x2x1
jax: 0.10.0
libtpu: 0.0.40
codegen_flags: <defaults>
</compile_context>

<pallas_src>
import functools

import jax
import jax.numpy as jnp
from jax.experimental import pallas as pl
from jax.experimental.pallas import tpu as pltpu


# ---------------------------------------------------------------------------
# Kernels
# ---------------------------------------------------------------------------
def _revin_norm_kernel(*refs, eps: float, affine: bool, inv_t: float):
    if affine:
        x_ref, w_ref, b_ref, y_ref, stats_ref = refs
    else:
        x_ref, y_ref, stats_ref = refs

    xf = x_ref[...].astype(jnp.float32)                    # (Bb, T, tC)

    # Two-pass statistics (numerically stable for offset time series).
    mean = jnp.sum(xf, axis=1, keepdims=True) * inv_t      # (Bb, 1, tC)
    d = xf - mean
    var = jnp.sum(d * d, axis=1, keepdims=True) * inv_t    # (Bb, 1, tC)
    std = jnp.sqrt(var + eps)
    inv_std = 1.0 / std                                     # C-sized divide only

    if affine:
        scale = inv_std * w_ref[...].astype(jnp.float32)    # (Bb/1, 1, tC)
        shift = b_ref[...].astype(jnp.float32) - mean * scale
    else:
        scale = inv_std
        shift = -(mean * scale)

    # Hot path: one multiply-add per element of the (Bb, T, tC) tile.
    y_ref[...] = (xf * scale + shift).astype(y_ref.dtype)
    stats_ref[:, 0:1, :] = mean.astype(stats_ref.dtype)
    stats_ref[:, 1:2, :] = std.astype(stats_ref.dtype)


def _revin_denorm_kernel(*refs, eps: float, affine: bool):
    if affine:
        x_ref, stats_ref, w_ref, b_ref, y_ref = refs
    else:
        x_ref, stats_ref, y_ref = refs

    x = x_ref[...].astype(jnp.float32)                      # (Bb, T, tC)
    stats = stats_ref[...].astype(jnp.float32)              # (Bb, 2, tC)
    mean = stats[:, 0:1, :]
    std = stats[:, 1:2, :]

    if affine:
        w = w_ref[...].astype(jnp.float32)                   # (1, 1, tC)
        b = b_ref[...].astype(jnp.float32)
        scale = std / (w + eps * eps)      # per-channel divide, off the T*C path
        shift = mean - b * scale
    else:
        scale = std
        shift = mean

    y_ref[...] = (x * scale + shift).astype(y_ref.dtype)


# ---------------------------------------------------------------------------
# Tiling helpers
# ---------------------------------------------------------------------------
def _chip_budgets():
    """(per-step block byte target, vmem_limit cap) gated on the chip."""
    vmem_phys = 64 * 1024 * 1024
    try:
        info = pltpu.get_tpu_info()
        vmem_phys = int(getattr(info, "vmem_capacity_bytes", vmem_phys))
    except Exception:
        pass
    if vmem_phys >= 96 * 1024 * 1024:          # v5e / v6e: 128 MiB physical
        return 8 << 20, 100 * 1024 * 1024
    return 5 << 20, 56 * 1024 * 1024           # v7x: 64 MiB per TensorCore


def _pick_tiles(b, t, c, itemsize, target_bytes):
    # Channel tile: only split channels when C is wide AND 128-aligned
    # (a block last-dim must be a multiple of 128 or equal the full dim).
    if c > 1024 and c % 128 == 0:
        k = c // 128
        d = 1
        for cand in (8, 4, 2, 1):
            if k % cand == 0:
                d = cand
                break
        tc = 128 * d
    else:
        tc = c
    n_c = c // tc

    # Batch tile: pack batches per grid step so each block is ~target_bytes
    # (per-grid-step overhead / tiny DMAs dominate a mem-bound op otherwise).
    per_batch = max(t * tc * itemsize, 1)
    bb = max(1, min(b, target_bytes // per_batch))
    # Megacore (v7x): keep >= 2 grid programs on a parallel axis if possible.
    if n_c == 1 and b > 1:
        bb = min(bb, -(-b // 2))               # ceil(b/2)
    return int(bb), int(tc), int(n_c)


def _vmem_limit(block_bytes_f32, cap):
    # ~double-buffered in + out blocks + f32 working set + margin, clamped to
    # the chip-appropriate cap.
    return int(min(max(8 * block_bytes_f32, 16 * 1024 * 1024), cap))


def _build_grid(n_b, n_c):
    """Grid + index maps; batch is the inner axis when channels are tiled so
    the (1,1,tC) affine blocks keep the same block index (no re-DMA)."""
    if n_c > 1:
        grid = (n_c, n_b)
        x_map = lambda ci, bi: (bi, 0, ci)
        w_map = lambda ci, bi: (0, 0, ci)
    else:
        grid = (n_b,)
        x_map = lambda bi: (bi, 0, 0)
        w_map = lambda bi: (0, 0, 0)
    return grid, x_map, w_map


# ---------------------------------------------------------------------------
# Wrapper
# ---------------------------------------------------------------------------
class RevIN:
    """JAX/Pallas port of the PyTorch RevIN module."""

    def __init__(self, num_features: int, eps: float = 1e-5, affine: bool = True):
        self.num_features = num_features
        self.eps = float(eps)
        self.affine = affine
        if affine:
            self.affine_weight = jnp.ones((num_features,), dtype=jnp.float32)
            self.affine_bias = jnp.zeros((num_features,), dtype=jnp.float32)
        else:
            self.affine_weight = None
            self.affine_bias = None
        # TODO(synk): mean/stdev kept as Python state to mirror the PyTorch
        # module; for jit/vmap of a whole model, return them explicitly.
        self._stats = None     # packed (B, 2, C): [mean; std]
        self.mean = None
        self.stdev = None

    # -- mode == 'norm' ------------------------------------------------------
    def _norm(self, x):
        B, T, C = x.shape
        assert C == self.num_features
        itemsize = jnp.dtype(x.dtype).itemsize
        target_bytes, vmem_cap = _chip_budgets()
        Bb, tC, nC = _pick_tiles(B, T, C, itemsize, target_bytes)
        nB = pl.cdiv(B, Bb)                     # ragged last block is fine
        grid, x_map, w_map = _build_grid(nB, nC)

        inputs = [x]
        in_specs = [pl.BlockSpec((Bb, T, tC), x_map)]
        if self.affine:
            inputs += [self.affine_weight.reshape(1, 1, C),
                       self.affine_bias.reshape(1, 1, C)]
            in_specs += [pl.BlockSpec((1, 1, tC), w_map)] * 2

        kernel = functools.partial(_revin_norm_kernel, eps=self.eps,
                                   affine=self.affine, inv_t=1.0 / T)
        block_bytes_f32 = Bb * T * tC * 4
        y, stats = pl.pallas_call(
            kernel,
            out_shape=(
                jax.ShapeDtypeStruct((B, T, C), x.dtype),
                jax.ShapeDtypeStruct((B, 2, C), jnp.float32),
            ),
            grid_spec=pltpu.PrefetchScalarGridSpec(
                num_scalar_prefetch=0,
                grid=grid,
                in_specs=in_specs,
                out_specs=[
                    pl.BlockSpec((Bb, T, tC), x_map),
                    pl.BlockSpec((Bb, 2, tC), x_map),
                ],
            ),
            compiler_params=pltpu.CompilerParams(
                dimension_semantics=("parallel",) * len(grid),
                vmem_limit_bytes=_vmem_limit(block_bytes_f32, vmem_cap)),
        )(*inputs)

        self._stats = stats
        self.mean = stats[:, 0:1, :]
        self.stdev = stats[:, 1:2, :]
        return y

    # -- mode == 'denorm' ----------------------------------------------------
    def _denorm(self, x):
        assert self._stats is not None, "call forward(x, 'norm') before 'denorm'"
        B, T, C = x.shape
        itemsize = jnp.dtype(x.dtype).itemsize
        target_bytes, vmem_cap = _chip_budgets()
        Bb, tC, nC = _pick_tiles(B, T, C, itemsize, target_bytes)
        nB = pl.cdiv(B, Bb)
        grid, x_map, w_map = _build_grid(nB, nC)

        inputs = [x, self._stats]
        in_specs = [
            pl.BlockSpec((Bb, T, tC), x_map),
            pl.BlockSpec((Bb, 2, tC), x_map),
        ]
        if self.affine:
            inputs += [self.affine_weight.reshape(1, 1, C),
                       self.affine_bias.reshape(1, 1, C)]
            in_specs += [pl.BlockSpec((1, 1, tC), w_map)] * 2

        kernel = functools.partial(_revin_denorm_kernel, eps=self.eps,
                                   affine=self.affine)
        block_bytes_f32 = Bb * T * tC * 4
        y = pl.pallas_call(
            kernel,
            out_shape=jax.ShapeDtypeStruct((B, T, C), x.dtype),
            grid_spec=pltpu.PrefetchScalarGridSpec(
                num_scalar_prefetch=0,
                grid=grid,
                in_specs=in_specs,
                out_specs=pl.BlockSpec((Bb, T, tC), x_map),
            ),
            compiler_params=pltpu.CompilerParams(
                dimension_semantics=("parallel",) * len(grid),
                vmem_limit_bytes=_vmem_limit(block_bytes_f32, vmem_cap)),
        )(*inputs)
        return y

    def __call__(self, x, mode: str):
        if mode == 'norm':
            return self._norm(x)
        elif mode == 'denorm':
            return self._denorm(x)
        raise NotImplementedError(mode)


# ---------------------------------------------------------------------------
# Reference (pure JAX) for verification
# ---------------------------------------------------------------------------
def _ref_norm(x, w, b, eps, affine):
    mean = jnp.mean(x, axis=1, keepdims=True)
    std = jnp.sqrt(jnp.var(x, axis=1, keepdims=True) + eps)
    y = (x - mean) / std
    if affine:
        y = y * w + b
    return y, mean, std


def _ref_denorm(x, mean, std, w, b, eps, affine):
    if affine:
        x = (x - b) / (w + eps * eps)
    return x * std + mean


def _check(B, T, C, affine, key):
    # Offset + scale the data so the two-pass variance path is exercised on
    # realistic (level-shifted) time series.
    x = jax.random.normal(key, (B, T, C), dtype=jnp.float32) * 3.0 + 10.0
    m = RevIN(num_features=C, eps=1e-5, affine=affine)

    y = m(x, 'norm')
    z = m(y, 'denorm')
    jax.block_until_ready(y)
    jax.block_until_ready(z)

    y_ref, mean_ref, std_ref = _ref_norm(x, m.affine_weight, m.affine_bias,
                                         m.eps, affine)
    z_ref = _ref_denorm(y_ref, mean_ref, std_ref, m.affine_weight,
                        m.affine_bias, m.eps, affine)

    assert jnp.allclose(y, y_ref, atol=1e-5, rtol=1e-5), "norm mismatch"
    assert jnp.allclose(m.mean, mean_ref, atol=1e-5, rtol=1e-5), "mean mismatch"
    assert jnp.allclose(m.stdev, std_ref, atol=1e-5, rtol=1e-5), "std mismatch"
    assert jnp.allclose(z, z_ref, atol=1e-5, rtol=1e-5), "denorm mismatch"
    assert jnp.allclose(z, x, atol=1e-3, rtol=1e-3), "roundtrip mismatch"


if __name__ == "__main__":
    key = jax.random.PRNGKey(0)
    k0, k1, k2 = jax.random.split(key, 3)
    _check(B=2, T=8, C=32, affine=True, key=k0)    # sub-128 C, no pad/slice
    _check(B=3, T=16, C=7, affine=True, key=k1)    # odd C, ragged batch block
    _check(B=2, T=8, C=32, affine=False, key=k2)   # no affine params / DMAs
    print("KERNEL_OK")
</pallas_src>

<mosaic_0001>
module attributes {stable_mosaic.version = 11 : i64} {
  func.func @_revin_norm_kernel(%arg0: i32, %arg1: memref<1x8x32xf32, #tpu.memory_space<vmem>>, %arg2: memref<1x1x32xf32, #tpu.memory_space<vmem>>, %arg3: memref<1x1x32xf32, #tpu.memory_space<vmem>>, %arg4: memref<1x8x32xf32, #tpu.memory_space<vmem>>, %arg5: memref<1x2x32xf32, #tpu.memory_space<vmem>>) attributes {dimension_semantics = [#tpu.dimension_semantics<parallel>], iteration_bounds = array<i64: 2>, scalar_prefetch = 0 : i64, scratch_operands = 0 : i64, tpu.core_type = #tpu.core_type<tc>, window_params = [{transform_indices = @transform_0, window_bounds = array<i64: 1, 8, 32>}, {pipeline_mode = #tpu.pipeline_mode<synchronous>, transform_indices = @transform_1, window_bounds = array<i64: 1, 1, 32>}, {pipeline_mode = #tpu.pipeline_mode<synchronous>, transform_indices = @transform_2, window_bounds = array<i64: 1, 1, 32>}, {transform_indices = @transform_3, window_bounds = array<i64: 1, 8, 32>}, {transform_indices = @transform_4, window_bounds = array<i64: 1, 2, 32>}]} {
    %c0 = arith.constant 0 : index
    %c0_0 = arith.constant 0 : index
    %c0_1 = arith.constant 0 : index
    %0 = vector.load %arg1[%c0, %c0_0, %c0_1] : memref<1x8x32xf32, #tpu.memory_space<vmem>>, vector<1x8x32xf32>
    %cst = arith.constant dense<0.000000e+00> : vector<1x32xf32>
    %1 = vector.multi_reduction <add>, %0, %cst [1] : vector<1x8x32xf32> to vector<1x32xf32>
    %2 = vector.shape_cast %1 : vector<1x32xf32> to vector<1x1x32xf32>
    %cst_2 = arith.constant 1.250000e-01 : f32
    %3 = vector.broadcast %cst_2 : f32 to vector<1x1x32xf32>
    %4 = arith.mulf %2, %3 : vector<1x1x32xf32>
    %5 = vector.broadcast %4 : vector<1x1x32xf32> to vector<1x8x32xf32>
    %6 = arith.subf %0, %5 : vector<1x8x32xf32>
    %7 = arith.mulf %6, %6 : vector<1x8x32xf32>
    %cst_3 = arith.constant dense<0.000000e+00> : vector<1x32xf32>
    %8 = vector.multi_reduction <add>, %7, %cst_3 [1] : vector<1x8x32xf32> to vector<1x32xf32>
    %9 = vector.shape_cast %8 : vector<1x32xf32> to vector<1x1x32xf32>
    %cst_4 = arith.constant 1.250000e-01 : f32
    %10 = vector.broadcast %cst_4 : f32 to vector<1x1x32xf32>
    %11 = arith.mulf %9, %10 : vector<1x1x32xf32>
    %cst_5 = arith.constant 9.99999974E-6 : f32
    %12 = vector.broadcast %cst_5 : f32 to vector<1x1x32xf32>
    %13 = arith.addf %11, %12 : vector<1x1x32xf32>
    %14 = math.sqrt %13 : vector<1x1x32xf32>
    %cst_6 = arith.constant 1.000000e+00 : f32
    %15 = vector.broadcast %cst_6 : f32 to vector<1x1x32xf32>
    %16 = arith.divf %15, %14 : vector<1x1x32xf32>
    %c0_7 = arith.constant 0 : index
    %c0_8 = arith.constant 0 : index
    %c0_9 = arith.constant 0 : index
    %17 = vector.load %arg2[%c0_7, %c0_8, %c0_9] : memref<1x1x32xf32, #tpu.memory_space<vmem>>, vector<1x1x32xf32>
    %18 = arith.mulf %16, %17 : vector<1x1x32xf32>
    %c0_10 = arith.constant 0 : index
    %c0_11 = arith.constant 0 : index
    %c0_12 = arith.constant 0 : index
    %19 = vector.load %arg3[%c0_10, %c0_11, %c0_12] : memref<1x1x32xf32, #tpu.memory_space<vmem>>, vector<1x1x32xf32>
    %20 = arith.mulf %4, %18 : vector<1x1x32xf32>
    %21 = arith.subf %19, %20 : vector<1x1x32xf32>
    %22 = vector.broadcast %18 : vector<1x1x32xf32> to vector<1x8x32xf32>
    %23 = arith.mulf %0, %22 : vector<1x8x32xf32>
    %24 = vector.broadcast %21 : vector<1x1x32xf32> to vector<1x8x32xf32>
    %25 = arith.addf %23, %24 : vector<1x8x32xf32>
    %c0_13 = arith.constant 0 : index
    %c0_14 = arith.constant 0 : index
    %c0_15 = arith.constant 0 : index
    %26 = vector.load %arg4[%c0_13, %c0_14, %c0_15] : memref<1x8x32xf32, #tpu.memory_space<vmem>>, vector<1x8x32xf32>
    tpu.vector_store %arg4[%c0_13, %c0_14, %c0_15], %25 {strides = array<i32>} : memref<1x8x32xf32, #tpu.memory_space<vmem>>, vector<1x8x32xf32>,
    %c0_16 = arith.constant 0 : index
    %c0_17 = arith.constant 0 : index
    %c0_18 = arith.constant 0 : index
    %27 = vector.load %arg5[%c0_16, %c0_17, %c0_18] : memref<1x2x32xf32, #tpu.memory_space<vmem>>, vector<1x1x32xf32>
    tpu.vector_store %arg5[%c0_16, %c0_17, %c0_18], %4 {strides = array<i32>} : memref<1x2x32xf32, #tpu.memory_space<vmem>>, vector<1x1x32xf32>,
    %c0_19 = arith.constant 0 : index
    %c1 = arith.constant 1 : index
    %c0_20 = arith.constant 0 : index
    %28 = vector.load %arg5[%c0_19, %c1, %c0_20] : memref<1x2x32xf32, #tpu.memory_space<vmem>>, vector<1x1x32xf32>
    tpu.vector_store %arg5[%c0_19, %c1, %c0_20], %14 {strides = array<i32>} : memref<1x2x32xf32, #tpu.memory_space<vmem>>, vector<1x1x32xf32>,
    return
  }
  func.func @transform_0(%arg0: i32) -> (i32, i32, i32) {
    %c0_i32 = arith.constant 0 : i32
    %c0_i32_0 = arith.constant 0 : i32
    %c0_i32_1 = arith.constant 0 : i32
    return %arg0, %c0_i32, %c0_i32_0 : i32, i32, i32
  }
  func.func @transform_1(%arg0: i32) -> (i32, i32, i32) {
    %c0_i32 = arith.constant 0 : i32
    %c0_i32_0 = arith.constant 0 : i32
    %c0_i32_1 = arith.constant 0 : i32
    %c0_i32_2 = arith.constant 0 : i32
    return %c0_i32, %c0_i32_0, %c0_i32_1 : i32, i32, i32
  }
  func.func @transform_2(%arg0: i32) -> (i32, i32, i32) {
    %c0_i32 = arith.constant 0 : i32
    %c0_i32_0 = arith.constant 0 : i32
    %c0_i32_1 = arith.constant 0 : i32
    %c0_i32_2 = arith.constant 0 : i32
    return %c0_i32, %c0_i32_0, %c0_i32_1 : i32, i32, i32
  }
  func.func @transform_3(%arg0: i32) -> (i32, i32, i32) {
    %c0_i32 = arith.constant 0 : i32
    %c0_i32_0 = arith.constant 0 : i32
    %c0_i32_1 = arith.constant 0 : i32
    return %arg0, %c0_i32, %c0_i32_0 : i32, i32, i32
  }
  func.func @transform_4(%arg0: i32) -> (i32, i32, i32) {
    %c0_i32 = arith.constant 0 : i32
    %c0_i32_0 = arith.constant 0 : i32
    %c0_i32_1 = arith.constant 0 : i32
    return %arg0, %c0_i32, %c0_i32_0 : i32, i32, i32
  }
}

</mosaic_0001>

<bundles_post_ra>
// kernel: tpu_custom_call.1
= control target key start
LH: loop header
LB: loop body
LE: loop exit
PB: predicated region body
PF: predicated region fallthrough
CT: control target
= control target key end

     0   :  { %10 = vsyncpa [#allocation3], 0  ;;  %s849_s0 = inlined_call_operand.hbm [shape: f32[2,8,32], index: 0, kind: input, shape index: {}]   ;;  %s850_s1 = inlined_call_operand.vmem [shape: f32[1,1,32], index: 1, kind: input, shape index: {}]   ;;  %s851_s2 = inlined_call_operand.vmem [shape: f32[1,1,32], index: 2, kind: input, shape index: {}]   ;;  %s852_s3 = inlined_call_operand.hbm [shape: f32[2,8,32], index: 3, kind: output, shape index: {0}]   ;;  %s853_s4 = inlined_call_operand.hbm [shape: f32[2,2,32], index: 4, kind: output, shape index: {1}]  }
   0x1   :  { %12 = vsyncpa [#allocation3 + $0x1], 0 }
   0x2   :  { %13 = vsyncpa [#allocation4], 0 }
   0x3   :  { %15 = vsyncpa [#allocation4 + $0x1], 0 }
   0x4   :  { %16 = vsyncpa [#allocation7], 0 }
   0x5   :  { %18 = vsyncpa [#allocation7 + $0x1], 0  ;;  %s637_s15 = smov 0   ;;  %s639_s16 = smov 0  }
   0x6   :  { %s641_s17 = smov 0   ;;  %s643_s18 = smov 0  }
   0x7 LB: > { %s658_s19 = sadd.s32 4294967295, %s607_s18   ;;  %s409_s20 = sadd.s32 4294967294, %s607_s18   ;;  %s607_s18 = sphi %s643_s18, %s868_s18   ;;  %s603_s17 = sphi %s641_s17, %s867_s17   ;;  %s599_s16 = sphi %s639_s16, %s866_s16   ;;  %s595_s15 = sphi %s637_s15, %s865_s15  }
   0x8   : > { %s662_s21 = sadd.s32 1, %s607_s18   ;;  %s31_s22 = sadd.s32 1, %s603_s17 }
   0x9   : > { %s28_s23 = ssub.s32 %s607_s18, %s662_s21  ;;  %p38_p0 = scmp.ne.s32.totalorder %s603_s17, %s599_s16 }
   0xa   : > { %p29_p1 = scmp.eq.s32.totalorder %s28_s23, 0  ;;  %p39_p2 = scmp.eq.s32.totalorder %s607_s18, 0 }
   0xb   : > { %p44_p3 = scmp.ne.s32.totalorder %s599_s16, %s595_s15  ;;  %p45_p4 = scmp.eq.s32.totalorder %s658_s19, 0 }
   0xc   : > { %s674_s24 = scalar_select %p29_p1, %s603_s17, %s31_s22  }
   0xd   : > { %p676_p5 = por %p39_p2, %p38_p0  ;;  %p680_p6 = por %p45_p4, %p44_p3 }
   0xe   : > { %p110_p7 = scmp.eq.s32.totalorder %s658_s19, 1  ;;  %p116_p8 = scmp.eq.s32.totalorder %s409_s20, 1 }
   0xf   : > { %p441_p10 = scmp.lt.s32.totalorder %s607_s18, 2  ;;  %s168_s29 = sand.u32 1, %s603_s17  }
  0x10   : > { %p687_p11 = por %p110_p7, %p38_p0  ;;  %p691_p12 = por %p116_p8, %p44_p3 }
  0x11   : > { %s413_s30 = sshll.u32 %s607_s18, 7  ;;  %s412_s5 = sshll.u32 %s168_s29, 3 }
  0x12   : > { %s857_s27 = scalar_select %p687_p11, 1, 0 }
  0x13   : > { %s858_s28 = scalar_select %p691_p12, 1, 0 }
  0x14   : > { %s700_s8 = scalar_lea.hbm %s849_s0, %s413_s30  ;;  %s172_s9 = scalar_lea.vmem [#allocation2], %s412_s5 }
  0x15   : > { %s179_s10 = sshll.u32 %s172_s9, 4  ;;  %p704_p13 = pnand %p441_p10, %p676_p5  ;;  %s708_s10 = int_to_ptr.vmem [resolvable:$true] %s179_s10 }
  0x16   : > { %s169_s12 = scalar_lea.sflag [#allocation3], %s168_s29  ;;  %s479_s13 = scalar_lea.hbm %s700_s8, 128 }
  0x17   : > { %p480_p2 = scmp.ne.s32.totalorder %s700_s8, %s479_s13  ;;  %p481_p3 = pneg %p704_p13 }
  0x18   : > { %s484_s22 = scalar_lea.hbm %s849_s0, 256  ;;  %p485_p5 = scmp.lt.u32.totalorder %s700_s8, %s849_s0 }
  0x19   : > { %p482_p4 = pnand %p481_p3, %p480_p2  ;;  %p486_p8 = scmp.lt.u32.totalorder %s484_s22, %s479_s13 }
  0x1a   : > { %p488_p9 = scmp.lt.u32.totalorder %s479_s13, %s700_s8 }
  0x1b   : > { %p483_p7 = pneg %p482_p4  ;;  %p487_p10 = por %p486_p8, %p485_p5 }
  0x1d   : > { %p489_p0 = por %p488_p9, %p487_p10 }
  0x1f   : > { %p490_p1 = pnand %p489_p0, %p483_p7 }
  0x21   : > { %493 = shalt.err (!%p490_p1)
}
  0x22   : > { %s494_s29 = scalar_lea.vmem %s708_s10, 128  ;;  %s609_s30 = smov [#allocation2]  }
  0x23   : > { %p495_p2 = scmp.ne.s32.totalorder %s708_s10, %s494_s29  ;;  %s499_s5 = sshll.u32 %s609_s30, 4  ;;  %s500_s5 = int_to_ptr.vmem [resolvable:$false] %s499_s5 }
  0x24   : > { %s501_s6 = scalar_lea.vmem %s500_s5, 256  ;;  %p502_p11 = scmp.lt.s32.totalorder %s708_s10, %s500_s5 }
  0x25   : > { %p497_p4 = pnand %p495_p2, %p481_p3  ;;  %p503_p5 = scmp.lt.s32.totalorder %s501_s6, %s494_s29 }
  0x27   : > { %p498_p12 = pneg %p497_p4  ;;  %p504_p8 = por %p503_p5, %p502_p11 }
  0x29   : > { %p505_p9 = pnand %p504_p8, %p498_p12 }
  0x2b   : > { %508 = shalt.err (!%p505_p9)
}
  0x2c   : > { %433 = dma.hbm_to_vmem [thread:$0]  (!%p704_p13), %s700_s8, 128, %s708_s10, %s169_s12  }
  0x2d   : > { %p860_p0 = scmp.lt.s32.totalorder %s607_s18, 3  ;;  %p861_p1 = scmp.ge.s32.totalorder %s607_s18, 1 }
  0x2f   : > { %p185_p3 = pnand %p861_p1, %p860_p0 }
  0x30   : > { %s742_s7 = sand.u32 (!%p185_p3), 1, %s599_s16  }
  0x31   : > { %188 = sbr.rel (%p185_p3) target bundleno = 148 (0x94), region = 32  ;;  %s415_s9 = sshll.u32 (!%p185_p3), %s742_s7, 3 }
  0x32   : > { %s191_s13 = scalar_lea.sflag (!%p185_p3), [#allocation3], %s742_s7  ;;  %s194_s11 = scalar_lea.vmem (!%p185_p3), [#allocation2], %s415_s9 }
  0x38   : > { %582 = dma.done.wait (%p680_p6), %s191_s13, 128  }
  0x39   : > { %584 = vsyncadd (%p680_p6), %s191_s13, 4294967168  ;;  %vm225_vm0 = vcmask 261120   ;;  %v752_v0 = vld [vmem:[%s194_s11] sm:$0xff]  ;;  %s417_s8 = sshll.u32 %s742_s7, 1  ;;  %vm272_vm1 = vcmask 253952   ;;  %s421_s12 = sshll.u32 %s658_s19, 5  ;;  %v259_v25 = vlaneseq }
  0x3a   : > { %v226_v1 = vsel %vm225_vm0, %v752_v0, 0.0  ;;  %s223_s26 = scalar_lea.vmem [#allocation6], %s417_s8  ;;  %s766_s22 = scalar_lea.hbm %s853_s4, %s421_s12 }
  0x3b   : > { %v227_v2 = vrot.slane %v226_v1, 4  ;;  %s307_s10 = sshll.u32 %s223_s26, 4  ;;  %s281_s23 = scalar_lea.sflag [#allocation7], %s742_s7  ;;  %s761_s10 = int_to_ptr.vmem [resolvable:$true] %s307_s10 }
  0x3c   : > { %s509_s25 = scalar_lea.vmem %s761_s10, 32  ;;  %p862_p11 = scmp.ne.s32.totalorder %s857_s27, 0 }
  0x3d   : > { %v228_v3 = vadd.f32 %v227_v2, %v226_v1  ;;  %p510_p6 = scmp.ne.s32.totalorder %s761_s10, %s509_s25  ;;  %s610_s29 = smov [#allocation6]  }
  0x3e   : > { %s513_s30 = sshll.u32 %s610_s29, 4  ;;  %s514_s30 = int_to_ptr.vmem [resolvable:$false] %s513_s30 }
  0x3f   : > { %v229_v4 = vrot.slane %v228_v3, 2  ;;  %p511_p12 = pnand %p510_p6, %p862_p11  ;;  %s515_s5 = scalar_lea.vmem %s514_s30, 64 }
  0x40   : > { %p516_p7 = scmp.lt.s32.totalorder %s761_s10, %s514_s30  ;;  %p517_p10 = scmp.lt.s32.totalorder %s515_s5, %s509_s25 }
  0x41   : > { %v230_v5 = vadd.f32 %v229_v4, %v228_v3  ;;  %p512_p13 = pneg %p511_p12 }
  0x42   : > { %p518_p2 = por %p517_p10, %p516_p7 }
  0x43   : > { %v231_v6 = vrot.slane %v230_v5, 1 }
  0x44   : > { %p519_p4 = pnand %p518_p2, %p512_p13 }
  0x45   : > { %v232_v7 = vadd.f32 %v231_v6, %v230_v5 }
  0x47   : > { %v233_v8 = vmul.f32 0.125, %v232_v7 }
  0x49   : > { %v234_v9 = vsub.f32 %v752_v0, %v233_v8  ;;  %273 = vst.msk [vmem:[%s223_s26] sm:$0x1] %vm272_vm1, %v233_v8 }
  0x4b   : > { %v235_v10 = vmul.f32 %v234_v9, %v234_v9 }
  0x4d   : > { %v236_v11 = vsel %vm225_vm0, %v235_v10, 0.0 }
  0x4e   : > { %v237_v12 = vrot.slane %v236_v11, 4 }
  0x50   : > { %v238_v13 = vadd.f32 %v237_v12, %v236_v11 }
  0x52   : > { %v239_v14 = vrot.slane %v238_v13, 2 }
  0x54   : > { %v240_v15 = vadd.f32 %v239_v14, %v238_v13 }
  0x56   : > { %v241_v16 = vrot.slane %v240_v15, 1 }
  0x58   : > { %v242_v17 = vadd.f32 %v241_v16, %v240_v15 }
  0x5a   : > { %v243_v18 = vmul.f32 0.125, %v242_v17 }
  0x5c   : > { %v244_v19 = vadd.f32 1e-05, %v243_v18 }
  0x5e   : > { %475 = vrsqrt.f32 %v244_v19  ;;  %vm247_vm2 = vcmp.eq.f32.partialorder %v244_v19, inf  ;;  %v250_v21 = vand.u32 2147483648, %v244_v19  ;;  %vm249_vm3 = vcmp.eq.f32.partialorder %v244_v19, 0.0 }
  0x68   : > { %v476_v20 = vpop.eup %475 }
  0x69   : > { %v246_v22 = vmul.f32 %v476_v20, %v244_v19 }
  0x6b   : > { %v248_v23 = vsel %vm247_vm2, %v244_v19, %v246_v22 }
  0x6c   : > { %v251_v24 = vsel %vm249_vm3, %v250_v21, %v248_v23 }
  0x6d   : > { %477 = vrcp.f32 %v251_v24  ;;  %274 = vst.msk [vmem:[%s223_s26 + $0x1] sm:$0x1] %vm272_vm1, %v251_v24 }
  0x6e   : > { %522 = shalt.err (!%p519_p4)
}
  0x6f   : > { %s523_s6 = scalar_lea.hbm %s766_s22, 32  ;;  %s527_s8 = scalar_lea.hbm %s853_s4, 64 }
  0x70   : > { %p524_p5 = scmp.ne.s32.totalorder %s766_s22, %s523_s6  ;;  %p528_p0 = scmp.lt.u32.totalorder %s766_s22, %s853_s4 }
  0x71   : > { %p529_p1 = scmp.lt.u32.totalorder %s527_s8, %s523_s6  ;;  %p531_p6 = scmp.lt.u32.totalorder %s523_s6, %s766_s22 }
  0x72   : > { %p525_p8 = pnand %p524_p5, %p862_p11 }
  0x73   : > { %p530_p3 = por %p529_p1, %p528_p0 }
  0x74   : > { %p526_p9 = pneg %p525_p8 }
  0x75   : > { %p532_p12 = por %p531_p6, %p530_p3 }
  0x77   : > { %p533_p13 = pnand %p532_p12, %p526_p9 }
  0x79   : > { %536 = shalt.err (!%p533_p13)
}
  0x7a   : > { %427 = dma.vmem_to_hbm [thread:$0]  (%p862_p11), %s761_s10, 32, %s766_s22, %s281_s23   ;;  %v260_v26 = vshrl.u32 %v259_v25, 7  ;;  %v254_v27 = vld [vmem:[%s850_s1] sm:$0x1]  ;;  %v478_v29 = vpop.eup %477 }
  0x7b   : > { %v255_v30 = vmul.f32 %v478_v29, %v254_v27  ;;  %v256_v31 = vld [vmem:[%s851_s2] sm:$0x1]  ;;  %s216_s10 = scalar_lea.vmem [#allocation5], %s415_s9  ;;  %s420_s23 = sshll.u32 %s658_s19, 7 }
  0x7c   : > { %v261_v28 = vsub.s32 0, %v260_v26  ;;  %s294_s22 = sshll.u32 %s216_s10, 4  ;;  %s806_s6 = scalar_lea.hbm %s852_s3, %s420_s23  ;;  %s801_s22 = int_to_ptr.vmem [resolvable:$true] %s294_s22 }
  0x7d   : > { %v257_v32 = vmul.f32 %v255_v30, %v233_v8  ;;  %s276_s13 = scalar_lea.sflag [#allocation4], %s742_s7  ;;  %s537_s11 = scalar_lea.vmem %s801_s22, 128 }
  0x7e   : > { %v262_v33 = vrot.slane %v255_v30, %v261_v28  ;;  %p538_p7 = scmp.ne.s32.totalorder %s801_s22, %s537_s11  ;;  %s611_s19 = smov [#allocation5]  }
  0x7f   : > { %v258_v34 = vsub.f32 %v256_v31, %v257_v32  ;;  %s541_s9 = sshll.u32 %s611_s19, 4  ;;  %s542_s9 = int_to_ptr.vmem [resolvable:$false] %s541_s9 }
  0x80   : > { %v263_v35 = vmul.f32 %v262_v33, %v752_v0  ;;  %p539_p10 = pnand %p538_p7, %p862_p11  ;;  %s543_s8 = scalar_lea.vmem %s542_s9, 256 }
  0x81   : > { %v268_v36 = vrot.slane %v258_v34, %v261_v28  ;;  %p544_p4 = scmp.lt.s32.totalorder %s801_s22, %s542_s9  ;;  %p545_p5 = scmp.lt.s32.totalorder %s543_s8, %s537_s11 }
  0x82   : > { %p540_p2 = pneg %p539_p10 }
  0x83   : > { %v270_v37 = vadd.f32 %v268_v36, %v263_v35  ;;  %p546_p8 = por %p545_p5, %p544_p4 }
  0x85   : > { %271 = vst.msk [vmem:[%s216_s10] sm:$0xff] %vm225_vm0, %v270_v37  ;;  %p547_p9 = pnand %p546_p8, %p540_p2 }
  0x87   : > { %550 = shalt.err (!%p547_p9)
}
  0x88   : > { %s551_s7 = scalar_lea.hbm %s806_s6, 128  ;;  %s555_s14 = scalar_lea.hbm %s852_s3, 256 }
  0x89   : > { %p552_p0 = scmp.ne.s32.totalorder %s806_s6, %s551_s7  ;;  %p556_p6 = scmp.lt.u32.totalorder %s806_s6, %s852_s3 }
  0x8a   : > { %p557_p12 = scmp.lt.u32.totalorder %s555_s14, %s551_s7  ;;  %p559_p7 = scmp.lt.u32.totalorder %s551_s7, %s806_s6 }
  0x8b   : > { %p553_p1 = pnand %p552_p0, %p862_p11 }
  0x8c   : > { %p558_p13 = por %p557_p12, %p556_p6 }
  0x8d   : > { %p554_p3 = pneg %p553_p1 }
  0x8e   : > { %p560_p10 = por %p559_p7, %p558_p13 }
  0x90   : > { %p561_p2 = pnand %p560_p10, %p554_p3 }
  0x92   : > { %564 = shalt.err (!%p561_p2)
}
  0x93   : > { %426 = dma.vmem_to_hbm [thread:$0]  (%p862_p11), %s801_s22, 128, %s806_s6, %s276_s13  }
  0x94 PF: > { %s319_s29 = sand.u32 1, %s595_s15   ;;  %p863_p4 = scmp.ne.s32.totalorder %s858_s28, 0 }
  0x95   : > { %p864_p5 = scmp.ge.s32.totalorder %s607_s18, 2  ;;  %s320_s10 = scalar_lea.sflag [#allocation4], %s319_s29 }
  0x97   : > { %p435_p8 = pnand %p864_p5, %p863_p4 }
  0x99   : > { %586 = dma.done.wait (!%p435_p8), %s320_s10, 128  }
  0x9a   : > { %588 = vsyncadd (!%p435_p8), %s320_s10, 4294967168  ;;  %s329_s23 = scalar_lea.sflag [#allocation7], %s319_s29 }
  0x9b   : > { %590 = dma.done.wait (!%p435_p8), %s329_s23, 32  }
  0x9c   : > { %592 = vsyncadd (!%p435_p8), %s329_s23, 4294967264  ;;  %p21_p11 = scmp.ge.s32.totalorder %s662_s21, 4   ;;  %s865_s15 = smov %s599_s16 }
  0x9d   : > { %s866_s16 = smov %s603_s17  ;;  %s867_s17 = smov %s674_s24 }
  0x9e   : > { %s868_s18 = smov %s662_s21  ;;  %23 = sbr.rel (!%p21_p11) target bundleno = 7 (0x7), region = 94 }
  0xa5   :  { %334 = vsyncpa [#allocation3], 1 }
  0xa6   :  { %336 = vsyncpa [#allocation3 + $0x1], 1 }
  0xa7   :  { %337 = vsyncpa [#allocation4], 1 }
  0xa8   :  { %339 = vsyncpa [#allocation4 + $0x1], 1 }
  0xa9   :  { %340 = vsyncpa [#allocation7], 1 }
  0xaa   :  { %342 = vsyncpa [#allocation7 + $0x1], 1 }

</bundles_post_ra>
